<compile_context>
chip_gen: v7x
topology: tpu7x:2x2x1
jax: 0.10.0
libtpu: 0.0.40
codegen_flags: <defaults>
</compile_context>

<pallas_src>
import functools

import jax
import jax.numpy as jnp
from jax.experimental import pallas as pl
from jax.experimental.pallas import tpu as pltpu


def _mha_kernel(x_ref, wqkv_ref, bqkv_ref, wo_ref, bo_ref,
                out_ref, attn_ref, *, n_heads):
    B, L, D = x_ref.shape
    H = n_heads
    dk = D // H

    x2 = x_ref[...].reshape(B * L, D)

    # Fused Q/K/V projection: one MXU matmul instead of 3*H lane-sliced ones.
    # (The attention scale is already folded into the W_Q / b_q columns.)
    qkv = jnp.dot(x2.astype(jnp.bfloat16), wqkv_ref[...],
                  preferred_element_type=jnp.float32) + bqkv_ref[...]

    # Regroup into head-major batched operands: (B*H, L, dk), index = b*H + h.
    def split_heads(offset):
        parts = []
        for b in range(B):
            rows = qkv[b * L:(b + 1) * L, :]                  # (L, 3D)
            for h in range(H):
                lo = offset + h * dk
                parts.append(rows[:, lo:lo + dk].reshape(1, L, dk))
        return jnp.concatenate(parts, axis=0)                 # (B*H, L, dk)

    q_s = split_heads(0)
    k_s = split_heads(D)
    v_s = split_heads(2 * D)

    # Scaled dot-product attention, all heads batched along the leading axis.
    scores = jnp.einsum('bld,bmd->blm',
                        q_s.astype(jnp.bfloat16), k_s.astype(jnp.bfloat16),
                        preferred_element_type=jnp.float32)   # (B*H, L, L)
    m = jnp.max(scores, axis=-1, keepdims=True)
    p = jnp.exp(scores - m)
    attn = p * pl.reciprocal(jnp.sum(p, axis=-1, keepdims=True), approx=True)

    ctx = jnp.einsum('blm,bmd->bld',
                     attn.astype(jnp.bfloat16), v_s.astype(jnp.bfloat16),
                     preferred_element_type=jnp.float32)      # (B*H, L, dk)

    # Concatenate heads back on the lane axis -> (B*L, D); single W_O matmul.
    ctx_rows = [jnp.concatenate([ctx[b * H + h] for h in range(H)], axis=-1)
                for b in range(B)]                            # each (L, D)
    ctx2 = jnp.concatenate(ctx_rows, axis=0)                  # (B*L, D)

    out = jnp.dot(ctx2.astype(jnp.bfloat16), wo_ref[...],
                  preferred_element_type=jnp.float32) + bo_ref[...]

    out_ref[...] = out.reshape(B, L, D).astype(out_ref.dtype)
    attn_ref[...] = attn.reshape(B, H, L, L).astype(attn_ref.dtype)


def multihead_attention(src, params, n_heads):
    """src: (B, L, d_model) f32. Returns (output (B, L, d_model), attn (B, H, L, L))."""
    B, L, D = src.shape
    dk = D // n_heads
    scale = float(dk) ** -0.5

    # Fold the attention scale into W_Q / b_q, fuse Q/K/V weights -> (D, 3D),
    # and keep matmul weights in bf16 (biases added post-accumulation in f32).
    wqkv = jnp.concatenate([params['wq'] * scale, params['wk'], params['wv']],
                           axis=1).astype(jnp.bfloat16)
    bqkv = jnp.concatenate([params['bq'] * scale, params['bk'], params['bv']],
                           axis=1).astype(jnp.float32)
    wo = params['wo'].astype(jnp.bfloat16)
    bo = params['bo'].astype(jnp.float32)

    vmem = pl.BlockSpec(memory_space=pltpu.MemorySpace.VMEM)
    out, attn = pl.pallas_call(
        functools.partial(_mha_kernel, n_heads=n_heads),
        out_shape=(jax.ShapeDtypeStruct((B, L, D), jnp.float32),
                   jax.ShapeDtypeStruct((B, n_heads, L, L), jnp.float32)),
        in_specs=[vmem, vmem, vmem, vmem, vmem],
        out_specs=(vmem, vmem),
    )(src, wqkv, bqkv, wo, bo)
    return out, attn


def _mha_reference(src, params, n_heads):
    """Pure-JAX f32 reference mirroring the PyTorch module."""
    B, L, D = src.shape
    dk = D // n_heads
    scale = float(dk) ** -0.5
    x2 = src.reshape(B * L, D)

    def proj(w, b):
        return (x2 @ w + b).reshape(B, L, n_heads, dk).transpose(0, 2, 1, 3)

    q = proj(params['wq'], params['bq'])
    k = proj(params['wk'], params['bk'])
    v = proj(params['wv'], params['bv'])
    scores = jnp.einsum('bhld,bhmd->bhlm', q, k) * scale
    attn = jax.nn.softmax(scores, axis=-1)
    ctx = jnp.einsum('bhlm,bhmd->bhld', attn, v)
    ctx = ctx.transpose(0, 2, 1, 3).reshape(B, L, D)
    out = ctx @ params['wo'] + params['bo']
    return out, attn


if __name__ == "__main__":
    B, L, D, H = 2, 8, 32, 4      # batch, q_len, d_model, n_heads
    key = jax.random.PRNGKey(0)
    ks = jax.random.split(key, 9)
    src = jax.random.normal(ks[0], (B, L, D), jnp.float32)

    def lin_w(k, fi, fo):
        return 0.02 * jax.random.normal(k, (fi, fo), jnp.float32)

    def lin_b(k, fo):
        return 0.1 * jax.random.normal(k, (1, fo), jnp.float32)

    params = {
        'wq': lin_w(ks[1], D, D), 'bq': lin_b(ks[5], D),
        'wk': lin_w(ks[2], D, D), 'bk': lin_b(ks[6], D),
        'wv': lin_w(ks[3], D, D), 'bv': lin_b(ks[7], D),
        'wo': lin_w(ks[4], D, D), 'bo': lin_b(ks[8], D),
    }

    out, attn = multihead_attention(src, params, H)
    out = jax.block_until_ready(out)
    attn = jax.block_until_ready(attn)

    assert out.shape == (B, L, D)
    assert attn.shape == (B, H, L, L)
    assert bool(jnp.all(jnp.isfinite(out)))
    assert bool(jnp.all(jnp.isfinite(attn)))

    # Loose tolerances: bf16 MXU inputs + approximate EUP reciprocal.
    ref_out, ref_attn = _mha_reference(src, params, H)
    assert bool(jnp.allclose(out, ref_out, atol=3e-3, rtol=3e-2)), \
        float(jnp.max(jnp.abs(out - ref_out)))
    assert bool(jnp.allclose(attn, ref_attn, atol=1e-2, rtol=3e-2)), \
        float(jnp.max(jnp.abs(attn - ref_attn)))

    print("KERNEL_OK")
</pallas_src>

<mosaic_0001>
module attributes {stable_mosaic.version = 11 : i64} {
  func.func @_mha_kernel(%arg0: memref<2x8x32xf32, #tpu.memory_space<vmem>>, %arg1: memref<32x96xbf16, #tpu.memory_space<vmem>>, %arg2: memref<1x96xf32, #tpu.memory_space<vmem>>, %arg3: memref<32x32xbf16, #tpu.memory_space<vmem>>, %arg4: memref<1x32xf32, #tpu.memory_space<vmem>>, %arg5: memref<2x8x32xf32, #tpu.memory_space<vmem>>, %arg6: memref<2x4x8x8xf32, #tpu.memory_space<vmem>>) attributes {dimension_semantics = [], scalar_prefetch = 0 : i64, scratch_operands = 0 : i64, tpu.core_type = #tpu.core_type<tc>} {
    %c0 = arith.constant 0 : index
    %c0_0 = arith.constant 0 : index
    %c0_1 = arith.constant 0 : index
    %0 = vector.load %arg0[%c0, %c0_0, %c0_1] : memref<2x8x32xf32, #tpu.memory_space<vmem>>, vector<2x8x32xf32>
    %1 = vector.shape_cast %0 : vector<2x8x32xf32> to vector<16x32xf32>
    %2 = arith.truncf %1 : vector<16x32xf32> to vector<16x32xbf16>
    %c0_2 = arith.constant 0 : index
    %c0_3 = arith.constant 0 : index
    %3 = vector.load %arg1[%c0_2, %c0_3] : memref<32x96xbf16, #tpu.memory_space<vmem>>, vector<32x96xbf16>
    %cst = arith.constant dense<0.000000e+00> : vector<16x96xf32>
    %4 = tpu.matmul %2, %3, %cst {dimension_numbers = #tpu.dot_dimension_numbers<[1], [0], [0], [1], [0, 0, 1, 1], [], []>} : vector<16x32xbf16>, vector<32x96xbf16>, vector<16x96xf32> -> vector<16x96xf32>
    %c0_4 = arith.constant 0 : index
    %c0_5 = arith.constant 0 : index
    %5 = vector.load %arg2[%c0_4, %c0_5] : memref<1x96xf32, #tpu.memory_space<vmem>>, vector<1x96xf32>
    %6 = vector.broadcast %5 : vector<1x96xf32> to vector<16x96xf32>
    %7 = arith.addf %4, %6 : vector<16x96xf32>
    %8 = vector.extract_strided_slice %7 {offsets = [0, 0], sizes = [8, 96], strides = [1, 1]} : vector<16x96xf32> to vector<8x96xf32>
    %9 = vector.extract_strided_slice %8 {offsets = [0, 0], sizes = [8, 8], strides = [1, 1]} : vector<8x96xf32> to vector<8x8xf32>
    %10 = vector.shape_cast %9 : vector<8x8xf32> to vector<1x8x8xf32>
    %11 = vector.extract_strided_slice %8 {offsets = [0, 8], sizes = [8, 8], strides = [1, 1]} : vector<8x96xf32> to vector<8x8xf32>
    %12 = vector.shape_cast %11 : vector<8x8xf32> to vector<1x8x8xf32>
    %13 = vector.extract_strided_slice %8 {offsets = [0, 16], sizes = [8, 8], strides = [1, 1]} : vector<8x96xf32> to vector<8x8xf32>
    %14 = vector.shape_cast %13 : vector<8x8xf32> to vector<1x8x8xf32>
    %15 = vector.extract_strided_slice %8 {offsets = [0, 24], sizes = [8, 8], strides = [1, 1]} : vector<8x96xf32> to vector<8x8xf32>
    %16 = vector.shape_cast %15 : vector<8x8xf32> to vector<1x8x8xf32>
    %17 = vector.extract_strided_slice %7 {offsets = [8, 0], sizes = [8, 96], strides = [1, 1]} : vector<16x96xf32> to vector<8x96xf32>
    %18 = vector.extract_strided_slice %17 {offsets = [0, 0], sizes = [8, 8], strides = [1, 1]} : vector<8x96xf32> to vector<8x8xf32>
    %19 = vector.shape_cast %18 : vector<8x8xf32> to vector<1x8x8xf32>
    %20 = vector.extract_strided_slice %17 {offsets = [0, 8], sizes = [8, 8], strides = [1, 1]} : vector<8x96xf32> to vector<8x8xf32>
    %21 = vector.shape_cast %20 : vector<8x8xf32> to vector<1x8x8xf32>
    %22 = vector.extract_strided_slice %17 {offsets = [0, 16], sizes = [8, 8], strides = [1, 1]} : vector<8x96xf32> to vector<8x8xf32>
    %23 = vector.shape_cast %22 : vector<8x8xf32> to vector<1x8x8xf32>
    %24 = vector.extract_strided_slice %17 {offsets = [0, 24], sizes = [8, 8], strides = [1, 1]} : vector<8x96xf32> to vector<8x8xf32>
    %25 = vector.shape_cast %24 : vector<8x8xf32> to vector<1x8x8xf32>
    %26 = tpu.concatenate %10, %12, %14, %16, %19, %21, %23, %25 in 0 : vector<1x8x8xf32>, vector<1x8x8xf32>, vector<1x8x8xf32>, vector<1x8x8xf32>, vector<1x8x8xf32>, vector<1x8x8xf32>, vector<1x8x8xf32>, vector<1x8x8xf32> -> vector<8x8x8xf32>
    %27 = vector.extract_strided_slice %7 {offsets = [0, 0], sizes = [8, 96], strides = [1, 1]} : vector<16x96xf32> to vector<8x96xf32>
    %28 = vector.extract_strided_slice %27 {offsets = [0, 32], sizes = [8, 8], strides = [1, 1]} : vector<8x96xf32> to vector<8x8xf32>
    %29 = vector.shape_cast %28 : vector<8x8xf32> to vector<1x8x8xf32>
    %30 = vector.extract_strided_slice %27 {offsets = [0, 40], sizes = [8, 8], strides = [1, 1]} : vector<8x96xf32> to vector<8x8xf32>
    %31 = vector.shape_cast %30 : vector<8x8xf32> to vector<1x8x8xf32>
    %32 = vector.extract_strided_slice %27 {offsets = [0, 48], sizes = [8, 8], strides = [1, 1]} : vector<8x96xf32> to vector<8x8xf32>
    %33 = vector.shape_cast %32 : vector<8x8xf32> to vector<1x8x8xf32>
    %34 = vector.extract_strided_slice %27 {offsets = [0, 56], sizes = [8, 8], strides = [1, 1]} : vector<8x96xf32> to vector<8x8xf32>
    %35 = vector.shape_cast %34 : vector<8x8xf32> to vector<1x8x8xf32>
    %36 = vector.extract_strided_slice %7 {offsets = [8, 0], sizes = [8, 96], strides = [1, 1]} : vector<16x96xf32> to vector<8x96xf32>
    %37 = vector.extract_strided_slice %36 {offsets = [0, 32], sizes = [8, 8], strides = [1, 1]} : vector<8x96xf32> to vector<8x8xf32>
    %38 = vector.shape_cast %37 : vector<8x8xf32> to vector<1x8x8xf32>
    %39 = vector.extract_strided_slice %36 {offsets = [0, 40], sizes = [8, 8], strides = [1, 1]} : vector<8x96xf32> to vector<8x8xf32>
    %40 = vector.shape_cast %39 : vector<8x8xf32> to vector<1x8x8xf32>
    %41 = vector.extract_strided_slice %36 {offsets = [0, 48], sizes = [8, 8], strides = [1, 1]} : vector<8x96xf32> to vector<8x8xf32>
    %42 = vector.shape_cast %41 : vector<8x8xf32> to vector<1x8x8xf32>
    %43 = vector.extract_strided_slice %36 {offsets = [0, 56], sizes = [8, 8], strides = [1, 1]} : vector<8x96xf32> to vector<8x8xf32>
    %44 = vector.shape_cast %43 : vector<8x8xf32> to vector<1x8x8xf32>
    %45 = tpu.concatenate %29, %31, %33, %35, %38, %40, %42, %44 in 0 : vector<1x8x8xf32>, vector<1x8x8xf32>, vector<1x8x8xf32>, vector<1x8x8xf32>, vector<1x8x8xf32>, vector<1x8x8xf32>, vector<1x8x8xf32>, vector<1x8x8xf32> -> vector<8x8x8xf32>
    %46 = vector.extract_strided_slice %7 {offsets = [0, 0], sizes = [8, 96], strides = [1, 1]} : vector<16x96xf32> to vector<8x96xf32>
    %47 = vector.extract_strided_slice %46 {offsets = [0, 64], sizes = [8, 8], strides = [1, 1]} : vector<8x96xf32> to vector<8x8xf32>
    %48 = vector.shape_cast %47 : vector<8x8xf32> to vector<1x8x8xf32>
    %49 = vector.extract_strided_slice %46 {offsets = [0, 72], sizes = [8, 8], strides = [1, 1]} : vector<8x96xf32> to vector<8x8xf32>
    %50 = vector.shape_cast %49 : vector<8x8xf32> to vector<1x8x8xf32>
    %51 = vector.extract_strided_slice %46 {offsets = [0, 80], sizes = [8, 8], strides = [1, 1]} : vector<8x96xf32> to vector<8x8xf32>
    %52 = vector.shape_cast %51 : vector<8x8xf32> to vector<1x8x8xf32>
    %53 = vector.extract_strided_slice %46 {offsets = [0, 88], sizes = [8, 8], strides = [1, 1]} : vector<8x96xf32> to vector<8x8xf32>
    %54 = vector.shape_cast %53 : vector<8x8xf32> to vector<1x8x8xf32>
    %55 = vector.extract_strided_slice %7 {offsets = [8, 0], sizes = [8, 96], strides = [1, 1]} : vector<16x96xf32> to vector<8x96xf32>
    %56 = vector.extract_strided_slice %55 {offsets = [0, 64], sizes = [8, 8], strides = [1, 1]} : vector<8x96xf32> to vector<8x8xf32>
    %57 = vector.shape_cast %56 : vector<8x8xf32> to vector<1x8x8xf32>
    %58 = vector.extract_strided_slice %55 {offsets = [0, 72], sizes = [8, 8], strides = [1, 1]} : vector<8x96xf32> to vector<8x8xf32>
    %59 = vector.shape_cast %58 : vector<8x8xf32> to vector<1x8x8xf32>
    %60 = vector.extract_strided_slice %55 {offsets = [0, 80], sizes = [8, 8], strides = [1, 1]} : vector<8x96xf32> to vector<8x8xf32>
    %61 = vector.shape_cast %60 : vector<8x8xf32> to vector<1x8x8xf32>
    %62 = vector.extract_strided_slice %55 {offsets = [0, 88], sizes = [8, 8], strides = [1, 1]} : vector<8x96xf32> to vector<8x8xf32>
    %63 = vector.shape_cast %62 : vector<8x8xf32> to vector<1x8x8xf32>
    %64 = tpu.concatenate %48, %50, %52, %54, %57, %59, %61, %63 in 0 : vector<1x8x8xf32>, vector<1x8x8xf32>, vector<1x8x8xf32>, vector<1x8x8xf32>, vector<1x8x8xf32>, vector<1x8x8xf32>, vector<1x8x8xf32>, vector<1x8x8xf32> -> vector<8x8x8xf32>
    %65 = arith.truncf %26 : vector<8x8x8xf32> to vector<8x8x8xbf16>
    %66 = arith.truncf %45 : vector<8x8x8xf32> to vector<8x8x8xbf16>
    "tpu.trace_start"() <{level = 10 : i32, message = "bld,bmd->blm"}> : () -> ()
    %cst_6 = arith.constant dense<0.000000e+00> : vector<8x8x8xf32>
    %67 = tpu.matmul %65, %66, %cst_6 {dimension_numbers = #tpu.dot_dimension_numbers<[2], [2], [1], [1], [0, 0, 0, 1, 1, 1], [0], [0]>} : vector<8x8x8xbf16>, vector<8x8x8xbf16>, vector<8x8x8xf32> -> vector<8x8x8xf32>
    "tpu.trace_stop"() : () -> ()
    %cst_7 = arith.constant dense<0xFF800000> : vector<8x8xf32>
    %68 = vector.multi_reduction <maximumf>, %67, %cst_7 [2] : vector<8x8x8xf32> to vector<8x8xf32>
    %69 = vector.shape_cast %68 : vector<8x8xf32> to vector<8x8x1xf32>
    %70 = vector.broadcast %69 : vector<8x8x1xf32> to vector<8x8x8xf32>
    %71 = arith.subf %67, %70 : vector<8x8x8xf32>
    %72 = math.exp %71 : vector<8x8x8xf32>
    %cst_8 = arith.constant dense<0.000000e+00> : vector<8x8xf32>
    %73 = vector.multi_reduction <add>, %72, %cst_8 [2] : vector<8x8x8xf32> to vector<8x8xf32>
    %74 = vector.shape_cast %73 : vector<8x8xf32> to vector<8x8x1xf32>
    %75 = tpu.reciprocal %74 {approx = true} : vector<8x8x1xf32> -> vector<8x8x1xf32>
    %76 = vector.broadcast %75 : vector<8x8x1xf32> to vector<8x8x8xf32>
    %77 = arith.mulf %72, %76 : vector<8x8x8xf32>
    %78 = arith.truncf %77 : vector<8x8x8xf32> to vector<8x8x8xbf16>
    %79 = arith.truncf %64 : vector<8x8x8xf32> to vector<8x8x8xbf16>
    "tpu.trace_start"() <{level = 10 : i32, message = "blm,bmd->bld"}> : () -> ()
    %cst_9 = arith.constant dense<0.000000e+00> : vector<8x8x8xf32>
    %80 = tpu.matmul %78, %79, %cst_9 {dimension_numbers = #tpu.dot_dimension_numbers<[2], [1], [1], [2], [0, 0, 0, 1, 1, 2], [0], [0]>} : vector<8x8x8xbf16>, vector<8x8x8xbf16>, vector<8x8x8xf32> -> vector<8x8x8xf32>
    "tpu.trace_stop"() : () -> ()
    %81 = vector.extract_strided_slice %80 {offsets = [0, 0, 0], sizes = [1, 8, 8], strides = [1, 1, 1]} : vector<8x8x8xf32> to vector<1x8x8xf32>
    %82 = vector.shape_cast %81 : vector<1x8x8xf32> to vector<8x8xf32>
    %83 = vector.extract_strided_slice %80 {offsets = [1, 0, 0], sizes = [1, 8, 8], strides = [1, 1, 1]} : vector<8x8x8xf32> to vector<1x8x8xf32>
    %84 = vector.shape_cast %83 : vector<1x8x8xf32> to vector<8x8xf32>
    %85 = vector.extract_strided_slice %80 {offsets = [2, 0, 0], sizes = [1, 8, 8], strides = [1, 1, 1]} : vector<8x8x8xf32> to vector<1x8x8xf32>
    %86 = vector.shape_cast %85 : vector<1x8x8xf32> to vector<8x8xf32>
    %87 = vector.extract_strided_slice %80 {offsets = [3, 0, 0], sizes = [1, 8, 8], strides = [1, 1, 1]} : vector<8x8x8xf32> to vector<1x8x8xf32>
    %88 = vector.shape_cast %87 : vector<1x8x8xf32> to vector<8x8xf32>
    %89 = tpu.concatenate %82, %84, %86, %88 in 1 : vector<8x8xf32>, vector<8x8xf32>, vector<8x8xf32>, vector<8x8xf32> -> vector<8x32xf32>
    %90 = vector.extract_strided_slice %80 {offsets = [4, 0, 0], sizes = [1, 8, 8], strides = [1, 1, 1]} : vector<8x8x8xf32> to vector<1x8x8xf32>
    %91 = vector.shape_cast %90 : vector<1x8x8xf32> to vector<8x8xf32>
    %92 = vector.extract_strided_slice %80 {offsets = [5, 0, 0], sizes = [1, 8, 8], strides = [1, 1, 1]} : vector<8x8x8xf32> to vector<1x8x8xf32>
    %93 = vector.shape_cast %92 : vector<1x8x8xf32> to vector<8x8xf32>
    %94 = vector.extract_strided_slice %80 {offsets = [6, 0, 0], sizes = [1, 8, 8], strides = [1, 1, 1]} : vector<8x8x8xf32> to vector<1x8x8xf32>
    %95 = vector.shape_cast %94 : vector<1x8x8xf32> to vector<8x8xf32>
    %96 = vector.extract_strided_slice %80 {offsets = [7, 0, 0], sizes = [1, 8, 8], strides = [1, 1, 1]} : vector<8x8x8xf32> to vector<1x8x8xf32>
    %97 = vector.shape_cast %96 : vector<1x8x8xf32> to vector<8x8xf32>
    %98 = tpu.concatenate %91, %93, %95, %97 in 1 : vector<8x8xf32>, vector<8x8xf32>, vector<8x8xf32>, vector<8x8xf32> -> vector<8x32xf32>
    %99 = tpu.concatenate %89, %98 in 0 : vector<8x32xf32>, vector<8x32xf32> -> vector<16x32xf32>
    %100 = arith.truncf %99 : vector<16x32xf32> to vector<16x32xbf16>
    %c0_10 = arith.constant 0 : index
    %c0_11 = arith.constant 0 : index
    %101 = vector.load %arg3[%c0_10, %c0_11] : memref<32x32xbf16, #tpu.memory_space<vmem>>, vector<32x32xbf16>
    %cst_12 = arith.constant dense<0.000000e+00> : vector<16x32xf32>
    %102 = tpu.matmul %100, %101, %cst_12 {dimension_numbers = #tpu.dot_dimension_numbers<[1], [0], [0], [1], [0, 0, 1, 1], [], []>} : vector<16x32xbf16>, vector<32x32xbf16>, vector<16x32xf32> -> vector<16x32xf32>
    %c0_13 = arith.constant 0 : index
    %c0_14 = arith.constant 0 : index
    %103 = vector.load %arg4[%c0_13, %c0_14] : memref<1x32xf32, #tpu.memory_space<vmem>>, vector<1x32xf32>
    %104 = vector.broadcast %103 : vector<1x32xf32> to vector<16x32xf32>
    %105 = arith.addf %102, %104 : vector<16x32xf32>
    %106 = vector.shape_cast %105 : vector<16x32xf32> to vector<2x8x32xf32>
    %c0_15 = arith.constant 0 : index
    %c0_16 = arith.constant 0 : index
    %c0_17 = arith.constant 0 : index
    %107 = vector.load %arg5[%c0_15, %c0_16, %c0_17] : memref<2x8x32xf32, #tpu.memory_space<vmem>>, vector<2x8x32xf32>
    tpu.vector_store %arg5[%c0_15, %c0_16, %c0_17], %106 {strides = array<i32>} : memref<2x8x32xf32, #tpu.memory_space<vmem>>, vector<2x8x32xf32>,
    %108 = vector.shape_cast %77 : vector<8x8x8xf32> to vector<2x4x8x8xf32>
    %c0_18 = arith.constant 0 : index
    %c0_19 = arith.constant 0 : index
    %c0_20 = arith.constant 0 : index
    %c0_21 = arith.constant 0 : index
    %109 = vector.load %arg6[%c0_18, %c0_19, %c0_20, %c0_21] : memref<2x4x8x8xf32, #tpu.memory_space<vmem>>, vector<2x4x8x8xf32>
    tpu.vector_store %arg6[%c0_18, %c0_19, %c0_20, %c0_21], %108 {strides = array<i32>} : memref<2x4x8x8xf32, #tpu.memory_space<vmem>>, vector<2x4x8x8xf32>,
    return
  }
}

</mosaic_0001>

<bundles_post_ra>
// kernel: tpu_custom_call.1
= control target key start
LH: loop header
LB: loop body
LE: loop exit
PB: predicated region body
PF: predicated region fallthrough
CT: control target
= control target key end

     0   :  { %12 = vsyncpa [#allocation3], 0  ;;  %s1878_s0 = inlined_call_operand.hbm [shape: f32[2,8,32], index: 0, kind: input, shape index: {}]   ;;  %s1879_s1 = inlined_call_operand.hbm [shape: bf16[32,96], index: 1, kind: input, shape index: {}]   ;;  %s1880_s2 = inlined_call_operand.vmem [shape: f32[1,96], index: 2, kind: input, shape index: {}]   ;;  %s1881_s3 = inlined_call_operand.hbm [shape: bf16[32,32], index: 3, kind: input, shape index: {}]   ;;  %s1882_s4 = inlined_call_operand.vmem [shape: f32[1,32], index: 4, kind: input, shape index: {}]   ;;  %s1883_s5 = inlined_call_operand.hbm [shape: f32[2,8,32], index: 5, kind: output, shape index: {0}]   ;;  %s1884_s6 = inlined_call_operand.hbm [shape: f32[2,4,8,8], index: 6, kind: output, shape index: {1}]  }
   0x1   :  { %13 = vsyncpa [#allocation6], 0 }
   0x2   :  { %14 = vsyncpa [#allocation4], 0 }
   0x3   :  { %15 = vsyncpa [#allocation10], 0  ;;  %s1543_s21 = smov [#allocation5]   ;;  %s1425_s25 = scalar_lea.hbm %s1879_s1, 256 }
   0x4   :  { %s33_s22 = sshll.u32 %s1543_s21, 4  ;;  %p1426_p0 = scmp.ne.s32.totalorder %s1879_s1, %s1425_s25  ;;  %s34_s22 = int_to_ptr.vmem [resolvable:$true] %s33_s22 }
   0x5   :  { %p1429_p1 = scmp.lt.u32.totalorder %s1425_s25, %s1879_s1 }
   0x7   :  { %p1431_p2 = pnand %p1429_p1, %p1426_p0 }
   0x9   :  { %1434 = shalt.err (!%p1431_p2)
}
   0xa   :  { %s1435_s30 = scalar_lea.vmem %s34_s22, 256  ;;  %p1440_p4 = scmp.lt.s32.totalorder %s34_s22, %s34_s22 }
   0xb   :  { %p1436_p3 = scmp.ne.s32.totalorder %s34_s22, %s1435_s30  ;;  %p1441_p5 = scmp.lt.s32.totalorder %s1435_s30, %s1435_s30 }
   0xd   :  { %p1442_p6 = por %p1441_p5, %p1440_p4 }
   0xf   :  { %p1443_p7 = pnand %p1442_p6, %p1436_p3 }
  0x11   :  { %1446 = shalt.err (!%p1443_p7)
}
  0x12   :  { %s1544_s7 = smov 64   ;;  %s1545_s8 = smov 4  }
  0x13   :  { %39 = dma.hbm_to_vmem [thread:$0]  %s1879_s1, 256, %s34_s22, [#allocation6], %s1544_s7, %s1544_s7, %s1545_s8  }
  0x14   :  { %s1546_s11 = smov [#allocation2]   ;;  %s1447_s15 = scalar_lea.hbm %s1878_s0, 256 }
  0x15   :  { %s21_s12 = sshll.u32 %s1546_s11, 4  ;;  %p1448_p8 = scmp.ne.s32.totalorder %s1878_s0, %s1447_s15  ;;  %s22_s12 = int_to_ptr.vmem [resolvable:$true] %s21_s12 }
  0x16   :  { %p1451_p9 = scmp.lt.u32.totalorder %s1447_s15, %s1878_s0 }
  0x18   :  { %p1453_p10 = pnand %p1451_p9, %p1448_p8 }
  0x1a   :  { %1456 = shalt.err (!%p1453_p10)
}
  0x1b   :  { %s1457_s20 = scalar_lea.vmem %s22_s12, 256  ;;  %p1462_p12 = scmp.lt.s32.totalorder %s22_s12, %s22_s12 }
  0x1c   :  { %p1458_p11 = scmp.ne.s32.totalorder %s22_s12, %s1457_s20  ;;  %p1463_p13 = scmp.lt.s32.totalorder %s1457_s20, %s1457_s20 }
  0x1e   :  { %p1464_p0 = por %p1463_p13, %p1462_p12 }
  0x20   :  { %p1465_p1 = pnand %p1464_p0, %p1458_p11 }
  0x22   :  { %1468 = shalt.err (!%p1465_p1)
}
  0x23   :  { %s1547_s1 = smov 128   ;;  %s1548_s21 = smov 8  }
  0x24   :  { %27 = dma.hbm_to_vmem [thread:$0]  %s1878_s0, 256, %s22_s12, [#allocation3], %s1547_s1, %s1547_s1, %s1548_s21  }
  0x25   :  { %s1549_s24 = smov [#allocation7]   ;;  %s1469_s28 = scalar_lea.hbm %s1881_s3, 256 }
  0x26   :  { %s47_s25 = sshll.u32 %s1549_s24, 4  ;;  %p1470_p2 = scmp.ne.s32.totalorder %s1881_s3, %s1469_s28  ;;  %s48_s25 = int_to_ptr.vmem [resolvable:$true] %s47_s25 }
  0x27   :  { %p1473_p3 = scmp.lt.u32.totalorder %s1469_s28, %s1881_s3 }
  0x29   :  { %p1475_p4 = pnand %p1473_p3, %p1470_p2 }
  0x2b   :  { %1478 = shalt.err (!%p1475_p4)
}
  0x2c   :  { %s1479_s11 = scalar_lea.vmem %s48_s25, 256  ;;  %p1484_p6 = scmp.lt.s32.totalorder %s48_s25, %s48_s25 }
  0x2d   :  { %p1480_p5 = scmp.ne.s32.totalorder %s48_s25, %s1479_s11  ;;  %p1485_p7 = scmp.lt.s32.totalorder %s1479_s11, %s1479_s11 }
  0x2f   :  { %p1486_p8 = por %p1485_p7, %p1484_p6 }
  0x31   :  { %p1487_p9 = pnand %p1486_p8, %p1480_p5 }
  0x33   :  { %1490 = shalt.err (!%p1487_p9)
}
  0x34   :  { %53 = dma.hbm_to_vmem [thread:$0]  %s1881_s3, 256, %s48_s25, [#allocation6], %s1544_s7, %s1544_s7, %s1545_s8  }
  0x35   :  { %1535 = dma.done.wait [#allocation3], 256  }
  0x36   :  { %1536 = vsyncadd [#allocation3], 4294967040 }
  0x37   :  { %1537 = dma.done.wait [#allocation6], 512  }
  0x38   :  { %1538 = vsyncadd [#allocation6], 4294966784  ;;  %v1550_v0 = vmov 0.0   ;;  %vm1551_vm0 = vmmov 0   ;;  %v1389_v1 = vld [vmem:[#allocation5] sm:$0xff]   ;;  %v1390_v2 = vld [vmem:[#allocation5 + $0x8] sm:$0xff]  }
  0x39   :  { %1245 = vmatprep.subr.bf16.mxu0 %v1550_v0  ;;  %1249 = vmatprep.mubr.msk.bf16.mxu0 %vm1551_vm0, %v1550_v0  ;;  %v66_v3 = vld [vmem:[#allocation2] sm:$0xff]  ;;  %v67_v4 = vld [vmem:[#allocation2 + $0x8] sm:$0xff]  ;;  %vm92_vm1 = vcmask 261120   ;;  %s1552_s13 = smov 104   ;;  %s1553_s14 = smov 120   ;;  %vm168_vm2 = vcmask 64512  }
  0x3a   :  { %1253 = vmatprep.subr.bf16.mxu1 %v1550_v0  ;;  %1255 = vmatprep.mubr.msk.bf16.mxu1 %vm1551_vm0, %v1550_v0  ;;  %v68_v5 = vpack.c.bf16 %v67_v4, %v66_v3  ;;  %v1183_v6 = vld [vmem:[%s1880_s2] ss:$0 sm:$0xff]  ;;  %s1554_s15 = smov 112   ;;  %s1555_s16 = smov 96   ;;  %vm659_vm3 = vcmask 1043456   ;;  %vm1052_vm4 = vcmask 130048  }
  0x3b   :  { %1246 = vmatpush3.bf16.msra.mxu0 %v1389_v1  ;;  %s1556_s2 = smov 16   ;;  %vm1054_vm5 = vcmask 195584   ;;  %s1558_s17 = smov [#allocation9]  }
  0x3c   :  { %1247 = vmatprep.subr.bf16.mxu0 %v1550_v0  ;;  %s1166_s18 = sshll.u32 %s1558_s17, 4  ;;  %s1167_s18 = int_to_ptr.vmem [resolvable:$true] %s1166_s18 }
  0x3d   :  { %s1491_s19 = scalar_lea.vmem %s1167_s18, 1024  ;;  %p1496_p11 = scmp.lt.s32.totalorder %s1167_s18, %s1167_s18 }
  0x3e   :  { %p1492_p10 = scmp.ne.s32.totalorder %s1167_s18, %s1491_s19  ;;  %p1497_p12 = scmp.lt.s32.totalorder %s1491_s19, %s1491_s19 }
  0x3f   :  { %1248 = vmatpush3.bf16.msra.mxu0 %v1390_v2 }
  0x40   :  { %1259 = vmatprep.subr.bf16.mxu0 %v1550_v0  ;;  %p1498_p13 = por %p1497_p12, %p1496_p11 }
  0x42   :  { %1250 = vmatmul.mubr.msk.bf16.vlgmr.msra.gmra.mrb[0].mxu0 %vm92_vm1, %v68_v5  ;;  %p1499_p0 = pnand %p1498_p13, %p1492_p10 }
  0x43   :  { %1261 = vmatprep.mubr.msk.bf16.mxu0 %vm1551_vm0, %v1550_v0 }
 0x115   :  { %v130_v7 = vpop.f32.mrb[0].mxu0 }
 0x116   :  { %v131_v8 = vadd.f32 %v1183_v6, %v130_v7  ;;  %v1251_v9 = vpop.f32.mrb[1].mxu0 }
 0x117   :  { %v133_v10 = vpop.f32.mrb[2].mxu0 }
 0x118   :  { %144 = vrot.lane.b32.xlu1 %v131_v8, %s1552_s13  ;;  %138 = vrot.lane.b32.xlu0 %v131_v8, %s1553_s14  ;;  %v1252_v11 = vpop.f32.mrb[3].mxu0  ;;  %v134_v12 = vadd.f32 %v1183_v6, %v133_v10  ;;  %v157_v13 = vpack.c.bf16 %v131_v8, %v131_v8 }
 0x11a   :  { %v1665_v23 = vpack.c.bf16 %v134_v12, %v134_v12 }
 0x11c   :  { %141 = vrot.lane.b32.xlu0 %v131_v8, %s1554_s15  ;;  %148 = vrot.lane.b32.xlu1 %v134_v12, %s1553_s14 }
 0x120   :  { %151 = vrot.lane.b32.xlu0 %v134_v12, %s1554_s15  ;;  %154 = vrot.lane.b32.xlu1 %v134_v12, %s1552_s13 }
 0x124   :  { %166 = vrot.lane.b32.xlu0 %v157_v13, %s1555_s16 }
 0x18a   :  { %v145_v14 = vpop.permute.xlu1 %144  ;;  %v139_v15 = vpop.permute.xlu0 %138 }
 0x18b   :  { %v1654_v16 = vpack.c.bf16 %v139_v15, %v139_v15  ;;  %v1657_v19 = vpack.c.bf16 %v145_v14, %v145_v14 }
 0x18d   :  { %216 = vrot.lane.b32.xlu1 %v1654_v16, %s1555_s16 }
 0x18e   :  { %v142_v17 = vpop.permute.xlu0 %141  ;;  %v149_v18 = vpop.permute.xlu1 %148 }
 0x18f   :  { %v1659_v20 = vpack.c.bf16 %v142_v17, %v142_v17  ;;  %v1663_v22 = vpack.c.bf16 %v149_v18, %v149_v18 }
 0x191   :  { %265 = vrot.lane.b32.xlu0 %v1659_v20, %s1555_s16  ;;  %314 = vrot.lane.b32.xlu1 %v1657_v19, %s1555_s16 }
 0x192   :  { %v152_v21 = vpop.permute.xlu0 %151  ;;  %v155_v24 = vpop.permute.xlu1 %154 }
 0x193   :  { %v1669_v26 = vpack.c.bf16 %v152_v21, %v152_v21  ;;  %v1671_v27 = vpack.c.bf16 %v155_v24, %v155_v24 }
 0x195   :  { %412 = vrot.lane.b32.xlu1 %v1663_v22, %s1555_s16  ;;  %363 = vrot.lane.b32.xlu0 %v1665_v23, %s1555_s16 }
 0x196   :  { %v167_v25 = vpop.permute.xlu0 %166 }
 0x197   :  { %v173_v28 = vsel %vm168_vm2, %v167_v25, 0 }
 0x198   :  { %1254 = vmatpush3.bf16.xpose.msra.mxu1 %v173_v28 }
 0x199   :  { %510 = vrot.lane.b32.xlu1 %v1671_v27, %s1555_s16  ;;  %461 = vrot.lane.b32.xlu0 %v1669_v26, %s1555_s16 }
 0x19a   :  { %1265 = vmatprep.subr.bf16.mxu1 %v1550_v0 }
 0x19d   :  { %654 = vrot.lane.b32.xlu1 %v157_v13, %s1544_s7 }
 0x19f   :  { %1256 = vmatmul.mubr.msk.bf16.vlgmr.msra.gmra.mrb[0].mxu1 %vm168_vm2, %v157_v13 }
 0x1a0   :  { %1267 = vmatprep.mubr.msk.bf16.mxu1 %vm1551_vm0, %v1550_v0 }
 0x1ff   :  { %v217_v29 = vpop.permute.xlu1 %216 }
 0x200   :  { %v222_v30 = vsel %vm168_vm2, %v217_v29, 0 }
 0x201   :  { %1260 = vmatpush3.bf16.xpose.msra.mxu0 %v222_v30 }
 0x202   :  { %1271 = vmatprep.subr.bf16.mxu0 %v1550_v0 }
 0x203   :  { %v266_v31 = vpop.permute.xlu0 %265  ;;  %v315_v33 = vpop.permute.xlu1 %314 }
 0x204   :  { %v271_v32 = vsel %vm168_vm2, %v266_v31, 0  ;;  %v320_v34 = vsel %vm168_vm2, %v315_v33, 0 }
 0x205   :  { %1266 = vmatpush3.bf16.xpose.msra.mxu1 %v271_v32 }
 0x206   :  { %1277 = vmatprep.subr.bf16.mxu1 %v1550_v0 }
 0x207   :  { %v364_v35 = vpop.permute.xlu0 %363  ;;  %v413_v37 = vpop.permute.xlu1 %412 }
 0x208   :  { %1262 = vmatmul.mubr.msk.bf16.vlgmr.msra.gmra.mrb[4].mxu0 %vm168_vm2, %v1654_v16  ;;  %v369_v36 = vsel %vm168_vm2, %v364_v35, 0  ;;  %v418_v38 = vsel %vm168_vm2, %v413_v37, 0 }
 0x209   :  { %1272 = vmatpush3.bf16.xpose.msra.mxu0 %v320_v34  ;;  %1273 = vmatprep.mubr.msk.bf16.mxu0 %vm1551_vm0, %v1550_v0 }
 0x20a   :  { %1283 = vmatprep.subr.bf16.mxu0 %v1550_v0 }
 0x20b   :  { %v462_v39 = vpop.permute.xlu0 %461  ;;  %v511_v40 = vpop.permute.xlu1 %510 }
 0x20c   :  { %1268 = vmatmul.mubr.msk.bf16.vlgmr.msra.gmra.mrb[4].mxu1 %vm168_vm2, %v1659_v20  ;;  %v467_v41 = vsel %vm168_vm2, %v462_v39, 0  ;;  %v516_v42 = vsel %vm168_vm2, %v511_v40, 0 }
 0x20d   :  { %1278 = vmatpush3.bf16.xpose.msra.mxu1 %v369_v36  ;;  %1279 = vmatprep.mubr.msk.bf16.mxu1 %vm1551_vm0, %v1550_v0 }
 0x20e   :  { %1289 = vmatprep.subr.bf16.mxu1 %v1550_v0 }
 0x20f   :  { %v655_v43 = vpop.permute.xlu1 %654 }
 0x210   :  { %1274 = vmatmul.mubr.msk.bf16.vlgmr.msra.gmra.mrb[8].mxu0 %vm168_vm2, %v1657_v19  ;;  %v661_v44 = vsel %vm659_vm3, %v655_v43, 0 }
 0x211   :  { %1284 = vmatpush3.bf16.xpose.msra.mxu0 %v418_v38  ;;  %1285 = vmatprep.mubr.msk.bf16.mxu0 %vm1551_vm0, %v1550_v0 }
 0x212   :  { %1295 = vmatprep.subr.bf16.mxu0 %v1550_v0 }
 0x214   :  { %1280 = vmatmul.mubr.msk.bf16.vlgmr.msra.gmra.mrb[8].mxu1 %vm168_vm2, %v1665_v23 }
 0x215   :  { %1290 = vmatpush3.bf16.xpose.msra.mxu1 %v467_v41  ;;  %1291 = vmatprep.mubr.msk.bf16.mxu1 %vm1551_vm0, %v1550_v0 }
 0x216   :  { %1301 = vmatprep.subr.bf16.mxu1 %v1550_v0 }
 0x218   :  { %1286 = vmatmul.mubr.msk.bf16.vlgmr.msra.gmra.mrb[12].mxu0 %vm168_vm2, %v1663_v22 }
 0x219   :  { %1296 = vmatpush3.bf16.xpose.msra.mxu0 %v516_v42  ;;  %1297 = vmatprep.mubr.msk.bf16.mxu0 %vm1551_vm0, %v1550_v0 }
 0x21a   :  { %1307 = vmatprep.subr.bf16.mxu0 %v1550_v0 }
 0x21c   :  { %1292 = vmatmul.mubr.msk.bf16.vlgmr.msra.gmra.mrb[12].mxu1 %vm168_vm2, %v1669_v26 }
 0x21d   :  { %1302 = vmatpush3.bf16.msra.mxu1 %v661_v44  ;;  %1303 = vmatprep.mubr.msk.bf16.mxu1 %vm1551_vm0, %v1550_v0 }
 0x21e   :  { %1313 = vmatprep.subr.bf16.mxu1 %v1550_v0 }
 0x220   :  { %1298 = vmatmul.mubr.msk.bf16.vlgmr.msra.gmra.mrb[16].mxu0 %vm168_vm2, %v1671_v27 }
 0x221   :  { %1309 = vmatprep.mubr.msk.bf16.mxu0 %vm1551_vm0, %v1550_v0 }
 0x272   :  { %v209_v45 = vpop.f32.mrb[0].mxu1 }
 0x273   :  { %v1257_v46 = vpop.f32.mrb[1].mxu1  ;;  %v558_v47 = vsel %vm168_vm2, %v209_v45, -inf }
 0x274   :  { %v212_v48 = vpop.f32.mrb[2].mxu1  ;;  %559 = vmax.xlane.f32.xlu0 %v558_v47 }
 0x275   :  { %v1258_v49 = vpop.f32.mrb[3].mxu1 }
 0x2db   :  { %v258_v50 = vpop.f32.mrb[4].mxu0 }
 0x2dc   :  { %v1263_v51 = vpop.f32.mrb[5].mxu0  ;;  %v561_v52 = vsel %vm168_vm2, %v258_v50, -inf }
 0x2dd   :  { %562 = vmax.xlane.f32.xlu1 %v561_v52  ;;  %v261_v53 = vpop.f32.mrb[6].mxu0 }
 0x2de   :  { %v1264_v54 = vpop.f32.mrb[7].mxu0 }
 0x2df   :  { %v307_v55 = vpop.f32.mrb[4].mxu1 }
 0x2e0   :  { %v1269_v56 = vpop.f32.mrb[5].mxu1  ;;  %v564_v57 = vsel %vm168_vm2, %v307_v55, -inf }
 0x2e1   :  { %v310_v58 = vpop.f32.mrb[6].mxu1  ;;  %565 = vmax.xlane.f32.xlu0 %v564_v57 }
 0x2e2   :  { %v1270_v59 = vpop.f32.mrb[7].mxu1 }
 0x2e3   :  { %v356_v60 = vpop.f32.mrb[8].mxu0 }
 0x2e4   :  { %v1275_v61 = vpop.f32.mrb[9].mxu0  ;;  %v567_v62 = vsel %vm168_vm2, %v356_v60, -inf }
 0x2e5   :  { %568 = vmax.xlane.f32.xlu0 %v567_v62  ;;  %v359_v63 = vpop.f32.mrb[10].mxu0 }
 0x2e6   :  { %v1276_v1 = vpop.f32.mrb[11].mxu0 }
 0x2e7   :  { %v1729_v2 = vpop.f32.mrb[8].mxu1 }
 0x2e8   :  { %v1281_v3 = vpop.f32.mrb[9].mxu1  ;;  %v570_v4 = vsel %vm168_vm2, %v1729_v2, -inf }
 0x2e9   :  { %v408_v5 = vpop.f32.mrb[10].mxu1  ;;  %571 = vmax.xlane.f32.xlu1 %v570_v4 }
 0x2ea   :  { %v1282_v6 = vpop.f32.mrb[11].mxu1 }
 0x2eb   :  { %v1733_v7 = vpop.f32.mrb[12].mxu0 }
 0x2ec   :  { %v1287_v8 = vpop.f32.mrb[13].mxu0  ;;  %v573_v9 = vsel %vm168_vm2, %v1733_v7, -inf }
 0x2ed   :  { %574 = vmax.xlane.f32.xlu0 %v573_v9  ;;  %v457_v10 = vpop.f32.mrb[14].mxu0 }
 0x2ee   :  { %v1288_v11 = vpop.f32.mrb[15].mxu0 }
 0x2ef   :  { %v503_v12 = vpop.f32.mrb[12].mxu1 }
 0x2f0   :  { %v1293_v13 = vpop.f32.mrb[13].mxu1  ;;  %v576_v14 = vsel %vm168_vm2, %v503_v12, -inf }
 0x2f1   :  { %v506_v15 = vpop.f32.mrb[14].mxu1  ;;  %577 = vmax.xlane.f32.xlu1 %v576_v14 }
 0x2f2   :  { %v1294_v17 = vpop.f32.mrb[15].mxu1 }
 0x2f3   :  { %v552_v18 = vpop.f32.mrb[16].mxu0 }
 0x2f4   :  { %v1299_v21 = vpop.f32.mrb[17].mxu0  ;;  %v579_v24 = vsel %vm168_vm2, %v552_v18, -inf }
 0x2f5   :  { %580 = vmax.xlane.f32.xlu0 %v579_v24  ;;  %v555_v25 = vpop.f32.mrb[18].mxu0 }
 0x2f6   :  { %v1300_v28 = vpop.f32.mrb[19].mxu0 }
 0x301   :  { %v560_v29 = vpop.xlane.xlu0 %559 }
 0x302   :  { %751 = vrot.lane.b32.xlu1 %v1659_v20, %s1544_s7  ;;  %v582_v30 = vsub.f32 %v209_v45, %v560_v29 }
 0x304   :  { %v590_v31 = vmul.f32 1.442695, %v582_v30 }
 0x306   :  { %799 = vrot.lane.b32.xlu1 %v1657_v19, %s1544_s7  ;;  %1393 = vpow2.f32 %v590_v31 }
 0x30b   :  { %703 = vrot.lane.b32.xlu0 %v1654_v16, %s1544_s7 }
 0x310   :  { %v1745_v32 = vpop.eup %1393 }
 0x311   :  { %v606_v33 = vsel %vm168_vm2, %v1745_v32, 0.0 }
 0x32a   :  { %607 = vadd.xlane.f32.xlu1 %v606_v33 }
 0x36a   :  { %v563_v34 = vpop.xlane.xlu1 %562 }
 0x36b   :  { %v583_v35 = vsub.f32 %v258_v50, %v563_v34 }
 0x36d   :  { %v592_v36 = vmul.f32 1.442695, %v583_v35 }
 0x36e   :  { %v566_v20 = vpop.xlane.xlu0 %565 }
 0x36f   :  { %1395 = vpow2.f32 %v592_v36  ;;  %v584_v37 = vsub.f32 %v307_v55, %v566_v20 }
 0x371   :  { %v594_v19 = vmul.f32 1.442695, %v584_v37 }
 0x372   :  { %v569_v38 = vpop.xlane.xlu0 %568 }
 0x373   :  { %1397 = vpow2.f32 %v594_v19  ;;  %v585_v16 = vsub.f32 %v356_v60, %v569_v38 }
 0x375   :  { %v596_v39 = vmul.f32 1.442695, %v585_v16 }
 0x376   :  { %v572_v50 = vpop.xlane.xlu1 %571 }
 0x377   :  { %1399 = vpow2.f32 %v596_v39  ;;  %v586_v51 = vsub.f32 %v1729_v2, %v572_v50 }
 0x379   :  { %v1749_v40 = vpop.eup %1395  ;;  %v598_v54 = vmul.f32 1.442695, %v586_v51 }
 0x37a   :  { %v609_v41 = vsel %vm168_vm2, %v1749_v40, 0.0  ;;  %v575_v43 = vpop.xlane.xlu0 %574 }
 0x37b   :  { %610 = vadd.xlane.f32.xlu0 %v609_v41  ;;  %v587_v53 = vsub.f32 %v1733_v7, %v575_v43  ;;  %1401 = vpow2.f32 %v598_v54 }
 0x37d   :  { %v1753_v42 = vpop.eup %1397  ;;  %v600_v56 = vmul.f32 1.442695, %v587_v53 }
 0x37e   :  { %v612_v44 = vsel %vm168_vm2, %v1753_v42, 0.0  ;;  %v578_v52 = vpop.xlane.xlu1 %577 }
 0x37f   :  { %613 = vadd.xlane.f32.xlu1 %v612_v44  ;;  %v588_v55 = vsub.f32 %v503_v12, %v578_v52  ;;  %1403 = vpow2.f32 %v600_v56 }
 0x381   :  { %v1757_v45 = vpop.eup %1399  ;;  %v602_v57 = vmul.f32 1.442695, %v588_v55 }
 0x382   :  { %v581_v46 = vpop.xlane.xlu0 %580  ;;  %v615_v47 = vsel %vm168_vm2, %v1757_v45, 0.0  ;;  %v752_v60 = vpop.permute.xlu1 %751 }
 0x383   :  { %616 = vadd.xlane.f32.xlu0 %v615_v47  ;;  %v589_v58 = vsub.f32 %v552_v18, %v581_v46  ;;  %1405 = vpow2.f32 %v602_v57  ;;  %v757_v9 = vsel %vm659_vm3, %v752_v60, 0 }
 0x385   :  { %v604_v59 = vmul.f32 1.442695, %v589_v58 }
 0x386   :  { %v704_v48 = vpop.permute.xlu0 %703  ;;  %v800_v61 = vpop.permute.xlu1 %799 }
 0x387   :  { %v709_v49 = vsel %vm659_vm3, %v704_v48, 0  ;;  %1407 = vpow2.f32 %v604_v59 }
 0x388   :  { %1308 = vmatpush3.bf16.msra.mxu0 %v709_v49 }
 0x389   :  { %1319 = vmatprep.subr.bf16.mxu0 %v1550_v0 }
 0x390   :  { %895 = vrot.lane.b32.xlu1 %v1663_v22, %s1544_s7  ;;  %v1769_v22 = vpop.eup %1401 }
 0x391   :  { %v618_v62 = vsel %vm168_vm2, %v1769_v22, 0.0 }
 0x399   :  { %847 = vrot.lane.b32.xlu0 %v1665_v23, %s1544_s7  ;;  %v1771_v23 = vpop.eup %1403 }
 0x39a   :  { %v1775_v63 = vpop.eup %1405  ;;  %v621_v3 = vsel %vm168_vm2, %v1771_v23, 0.0 }
 0x39b   :  { %v624_v2 = vsel %vm168_vm2, %v1775_v63, 0.0  ;;  %v1781_v4 = vpop.eup %1407 }
 0x39c   :  { %v627_v5 = vsel %vm168_vm2, %v1781_v4, 0.0 }
 0x3b4   :  { %619 = vadd.xlane.f32.xlu1 %v618_v62 }
 0x3b7   :  { %v608_v1 = vpop.xlane.xlu1 %607 }
 0x3b8   :  { %1409 = vrcp.f32 %v608_v1  ;;  %625 = vadd.xlane.f32.xlu1 %v624_v2  ;;  %622 = vadd.xlane.f32.xlu0 %v621_v3  ;;  %v1391_v1 = vld [vmem:[#allocation7] sm:$0xff]  }
 0x3bc   :  { %628 = vadd.xlane.f32.xlu0 %v627_v5  ;;  %v1392_v5 = vld [vmem:[#allocation7 + $0x8] sm:$0xff]  }
 0x3c2   :  { %v1410_v6 = vpop.eup %1409 }
 0x3c3   :  { %v638_v7 = vmul.f32 %v1410_v6, %v1745_v32 }
 0x3c5   :  { %1141 = vst.msk [vmem:[#allocation9] sm:$0xff] %vm168_vm2, %v638_v7  ;;  %v646_v8 = vpack.c.bf16 %v638_v7, %v638_v7 }
 0x3c7   :  { %1304 = vmatmul.mubr.msk.bf16.vlgmr.msra.gmra.mrb[16].mxu1 %vm168_vm2, %v646_v8 }
 0x3c8   :  { %1314 = vmatpush3.bf16.msra.mxu1 %v757_v9  ;;  %1315 = vmatprep.mubr.msk.bf16.mxu1 %vm1551_vm0, %v1550_v0 }
 0x3c9   :  { %991 = vrot.lane.b32.xlu1 %v1671_v27, %s1544_s7  ;;  %1325 = vmatprep.subr.bf16.mxu1 %v1550_v0  ;;  %v805_v27 = vsel %vm659_vm3, %v800_v61, 0 }
 0x3d2   :  { %943 = vrot.lane.b32.xlu0 %v1669_v26, %s1544_s7  ;;  %s1557_s7 = smov 24  }
 0x408   :  { %v611_v10 = vpop.xlane.xlu0 %610 }
 0x409   :  { %1411 = vrcp.f32 %v611_v10 }
 0x40c   :  { %v614_v11 = vpop.xlane.xlu1 %613 }
 0x40d   :  { %1413 = vrcp.f32 %v614_v11 }
 0x410   :  { %v617_v12 = vpop.xlane.xlu0 %616  ;;  %v896_v29 = vpop.permute.xlu1 %895 }
 0x411   :  { %1415 = vrcp.f32 %v617_v12  ;;  %v901_v31 = vsel %vm659_vm3, %v896_v29, 0 }
 0x413   :  { %v1412_v13 = vpop.eup %1411 }
 0x414   :  { %v639_v14 = vmul.f32 %v1412_v13, %v1749_v40  ;;  %v848_v26 = vpop.permute.xlu0 %847 }
 0x415   :  { %v853_v28 = vsel %vm659_vm3, %v848_v26, 0 }
 0x416   :  { %1142 = vst.msk [vmem:[#allocation9 + $0x8] sm:$0xff] %vm168_vm2, %v639_v14  ;;  %v647_v15 = vpack.c.bf16 %v639_v14, %v639_v14 }
 0x417   :  { %v1414_v17 = vpop.eup %1413 }
 0x418   :  { %v640_v18 = vmul.f32 %v1414_v17, %v1753_v42  ;;  %1310 = vmatmul.mubr.msk.bf16.vlgmr.msra.gmra.mrb[20].mxu0 %vm168_vm2, %v647_v15 }
 0x419   :  { %1320 = vmatpush3.bf16.msra.mxu0 %v805_v27  ;;  %1321 = vmatprep.mubr.msk.bf16.mxu0 %vm1551_vm0, %v1550_v0 }
 0x41a   :  { %1143 = vst.msk [vmem:[#allocation9 + $0x10] sm:$0xff] %vm168_vm2, %v640_v18  ;;  %v648_v21 = vpack.c.bf16 %v640_v18, %v640_v18  ;;  %1331 = vmatprep.subr.bf16.mxu0 %v1550_v0 }
 0x41b   :  { %v1416_v24 = vpop.eup %1415 }
 0x41c   :  { %v641_v25 = vmul.f32 %v1416_v24, %v1757_v45  ;;  %1316 = vmatmul.mubr.msk.bf16.vlgmr.msra.gmra.mrb[20].mxu1 %vm168_vm2, %v648_v21 }
 0x41d   :  { %1326 = vmatpush3.bf16.msra.mxu1 %v853_v28  ;;  %1327 = vmatprep.mubr.msk.bf16.mxu1 %vm1551_vm0, %v1550_v0 }
 0x41e   :  { %1144 = vst.msk [vmem:[#allocation9 + $0x18] sm:$0xff] %vm168_vm2, %v641_v25  ;;  %v649_v30 = vpack.c.bf16 %v641_v25, %v641_v25  ;;  %1337 = vmatprep.subr.bf16.mxu1 %v1550_v0 }
 0x420   :  { %1322 = vmatmul.mubr.msk.bf16.vlgmr.msra.gmra.mrb[24].mxu0 %vm168_vm2, %v649_v30 }
 0x421   :  { %1332 = vmatpush3.bf16.msra.mxu0 %v901_v31  ;;  %1333 = vmatprep.mubr.msk.bf16.mxu0 %vm1551_vm0, %v1550_v0 }
 0x422   :  { %1343 = vmatprep.subr.bf16.mxu0 %v1550_v0 }
 0x441   :  { %v620_v32 = vpop.xlane.xlu1 %619 }
 0x442   :  { %1417 = vrcp.f32 %v620_v32 }
 0x445   :  { %v626_v33 = vpop.xlane.xlu1 %625  ;;  %v623_v34 = vpop.xlane.xlu0 %622 }
 0x446   :  { %1419 = vrcp.f32 %v626_v33 }
 0x447   :  { %1421 = vrcp.f32 %v623_v34 }
 0x449   :  { %v629_v35 = vpop.xlane.xlu0 %628  ;;  %v992_v42 = vpop.permute.xlu1 %991 }
 0x44a   :  { %1423 = vrcp.f32 %v629_v35  ;;  %v997_v46 = vsel %vm659_vm3, %v992_v42, 0 }
 0x44c   :  { %v1418_v36 = vpop.eup %1417 }
 0x44d   :  { %v642_v20 = vmul.f32 %v1418_v36, %v1769_v22  ;;  %v944_v37 = vpop.permute.xlu0 %943 }
 0x44e   :  { %v949_v40 = vsel %vm659_vm3, %v944_v37, 0 }
 0x44f   :  { %1145 = vst.msk [vmem:[#allocation9 + $0x20] sm:$0xff] %vm168_vm2, %v642_v20  ;;  %v650_v19 = vpack.c.bf16 %v642_v20, %v642_v20 }
 0x450   :  { %v1420_v38 = vpop.eup %1419 }
 0x451   :  { %v1422_v16 = vpop.eup %1421  ;;  %v644_v39 = vmul.f32 %v1420_v38, %v1775_v63  ;;  %1328 = vmatmul.mubr.msk.bf16.vlgmr.msra.gmra.mrb[24].mxu1 %vm168_vm2, %v650_v19 }
 0x452   :  { %v643_v41 = vmul.f32 %v1422_v16, %v1771_v23  ;;  %1338 = vmatpush3.bf16.msra.mxu1 %v949_v40  ;;  %1339 = vmatprep.mubr.msk.bf16.mxu1 %vm1551_vm0, %v1550_v0 }
 0x453   :  { %1147 = vst.msk [vmem:[#allocation9 + $0x30] sm:$0xff] %vm168_vm2, %v644_v39  ;;  %1349 = vmatprep.subr.bf16.mxu1 %v1550_v0  ;;  %v652_v47 = vpack.c.bf16 %v644_v39, %v644_v39 }
 0x454   :  { %v1424_v43 = vpop.eup %1423  ;;  %1146 = vst.msk [vmem:[#allocation9 + $0x28] sm:$0xff] %vm168_vm2, %v643_v41  ;;  %v651_v44 = vpack.c.bf16 %v643_v41, %v643_v41 }
 0x455   :  { %v645_v45 = vmul.f32 %v1424_v43, %v1781_v4 }
 0x456   :  { %1334 = vmatmul.mubr.msk.bf16.vlgmr.msra.gmra.mrb[28].mxu0 %vm168_vm2, %v651_v44 }
 0x457   :  { %1148 = vst.msk [vmem:[#allocation9 + $0x38] sm:$0xff] %vm168_vm2, %v645_v45  ;;  %1344 = vmatpush3.bf16.msra.mxu0 %v997_v46  ;;  %1345 = vmatprep.mubr.msk.bf16.mxu0 %vm1551_vm0, %v1550_v0  ;;  %v653_v48 = vpack.c.bf16 %v645_v45, %v645_v45 }
 0x459   :  { %1340 = vmatmul.mubr.msk.bf16.vlgmr.msra.gmra.mrb[28].mxu1 %vm168_vm2, %v652_v47 }
 0x45a   :  { %1353 = vmatprep.mubr.msk.bf16.mxu1 %vm1551_vm0, %v1550_v0  ;;  %1350 = vmatpush3.bf16.msra.mxu1 %v1391_v1 }
 0x45b   :  { %1351 = vmatprep.subr.bf16.mxu1 %v1550_v0 }
 0x45e   :  { %1346 = vmatmul.mubr.msk.bf16.vlgmr.msra.gmra.mrb[32].mxu0 %vm168_vm2, %v653_v48  ;;  %1352 = vmatpush3.bf16.msra.mxu1 %v1392_v5 }
 0x49a   :  { %v697_v49 = vpop.f32.mrb[16].mxu1 }
 0x49b   :  { %v1305_v50 = vpop.f32.mrb[17].mxu1 }
 0x49c   :  { %v700_v51 = vpop.f32.mrb[18].mxu1 }
 0x49d   :  { %v1306_v52 = vpop.f32.mrb[19].mxu1 }
 0x4eb   :  { %v745_v53 = vpop.f32.mrb[20].mxu0 }
 0x4ec   :  { %v1311_v54 = vpop.f32.mrb[21].mxu0 }
 0x4ed   :  { %v748_v55 = vpop.f32.mrb[22].mxu0 }
 0x4ee   :  { %v1312_v56 = vpop.f32.mrb[23].mxu0 }
 0x4ef   :  { %v793_v57 = vpop.f32.mrb[20].mxu1 }
 0x4f0   :  { %v1317_v58 = vpop.f32.mrb[21].mxu1 }
 0x4f1   :  { %v796_v59 = vpop.f32.mrb[22].mxu1 }
 0x4f2   :  { %v1318_v60 = vpop.f32.mrb[23].mxu1 }
 0x4f3   :  { %v841_v22 = vpop.f32.mrb[24].mxu0 }
 0x4f4   :  { %v1323_v23 = vpop.f32.mrb[25].mxu0 }
 0x4f5   :  { %v844_v61 = vpop.f32.mrb[26].mxu0 }
 0x4f6   :  { %v1324_v62 = vpop.f32.mrb[27].mxu0 }
 0x524   :  { %v889_v63 = vpop.f32.mrb[24].mxu1 }
 0x525   :  { %v1329_v2 = vpop.f32.mrb[25].mxu1 }
 0x526   :  { %v892_v3 = vpop.f32.mrb[26].mxu1 }
 0x527   :  { %v1330_v4 = vpop.f32.mrb[27].mxu1 }
 0x529   :  { %v937_v6 = vpop.f32.mrb[28].mxu0 }
 0x52a   :  { %v1374_v7 = vpack.i.bf16 %v937_v6, %v745_v53  ;;  %v1335_v8 = vpop.f32.mrb[29].mxu0 }
 0x52b   :  { %v940_v9 = vpop.f32.mrb[30].mxu0 }
 0x52c   :  { %1375 = vrot.lane.b32.xlu0 %v1374_v7, %s1548_s21  ;;  %v1336_v10 = vpop.f32.mrb[31].mxu0  ;;  %v985_v11 = vpop.f32.mrb[28].mxu1 }
 0x52d   :  { %v1379_v12 = vpack.i.bf16 %v985_v11, %v793_v57  ;;  %v1341_v13 = vpop.f32.mrb[29].mxu1 }
 0x52e   :  { %v988_v14 = vpop.f32.mrb[30].mxu1 }
 0x52f   :  { %1380 = vrot.lane.b32.xlu1 %v1379_v12, %s1556_s2  ;;  %v1342_v15 = vpop.f32.mrb[31].mxu1 }
 0x531   :  { %v1033_v17 = vpop.f32.mrb[32].mxu0 }
 0x532   :  { %v1384_v27 = vpack.i.bf16 %v1033_v17, %v841_v22  ;;  %v1347_v18 = vpop.f32.mrb[33].mxu0 }
 0x533   :  { %v1036_v0 = vpop.f32.mrb[34].mxu0 }
 0x534   :  { %1385 = vrot.lane.b32.xlu0 %v1384_v27, %s1557_s7  ;;  %v1348_v26 = vpop.f32.mrb[35].mxu0 }
 0x59e   :  { %v1376_v21 = vpop.permute.xlu0 %1375 }
 0x59f   :  { %v1378_v25 = vunpack.i.h.bf16 %v1376_v21  ;;  %v1377_v28 = vunpack.i.l.bf16 %v1376_v21 }
 0x5a1   :  { %v1381_v24 = vpop.permute.xlu1 %1380  ;;  %v1068_v32 = vsel %vm168_vm2, %v889_v63, %v1378_v25  ;;  %v1051_v33 = vsel %vm168_vm2, %v697_v49, %v1377_v28 }
 0x5a2   :  { %v1383_v29 = vunpack.i.h.bf16 %v1381_v24  ;;  %v1382_v30 = vunpack.i.l.bf16 %v1381_v24 }
 0x5a4   :  { %v1053_v36 = vsel %vm1052_vm4, %v1051_v33, %v1382_v30  ;;  %v1069_v20 = vsel %vm1052_vm4, %v1068_v32, %v1383_v29 }
 0x5a6   :  { %v1386_v31 = vpop.permute.xlu0 %1385 }
 0x5a7   :  { %v1388_v34 = vunpack.i.h.bf16 %v1386_v31  ;;  %v1387_v35 = vunpack.i.l.bf16 %v1386_v31 }
 0x5a9   :  { %v1070_v37 = vsel %vm1054_vm5, %v1069_v20, %v1388_v34  ;;  %v1055_v19 = vsel %vm1054_vm5, %v1053_v36, %v1387_v35 }
 0x5aa   :  { %v1071_v38 = vpack.c.bf16 %v1070_v37, %v1055_v19 }
 0x5ac   :  { %1354 = vmatmul.mubr.msk.bf16.vlgmr.msra.gmra.mrb[32].mxu1 %vm92_vm1, %v1071_v38 }
 0x5ad   :  { %1502 = shalt.err (!%p1499_p0)
}
 0x5ae   :  { %s1503_s23 = scalar_lea.hbm %s1884_s6, 1024 }
 0x5af   :  { %p1504_p1 = scmp.ne.s32.totalorder %s1884_s6, %s1503_s23  ;;  %p1507_p2 = scmp.lt.u32.totalorder %s1503_s23, %s1884_s6 }
 0x5b1   :  { %p1509_p3 = pnand %p1507_p2, %p1504_p1 }
 0x5b3   :  { %1512 = shalt.err (!%p1509_p3)
}
 0x5b4   :  { %1172 = dma.vmem_to_hbm [thread:$0]  %s1167_s18, 1024, %s1884_s6, [#allocation10], %s1547_s1, %s1547_s1, %s1548_s21  }
 0x5b5   :  { %v1203_v16 = vld [vmem:[%s1882_s4] ss:$0 sm:$0xff]  ;;  %s1559_s10 = smov [#allocation8]  }
 0x5b6   :  { %s1154_s11 = sshll.u32 %s1559_s10, 4  ;;  %s1155_s11 = int_to_ptr.vmem [resolvable:$true] %s1154_s11 }
 0x5b7   :  { %s1513_s0 = scalar_lea.vmem %s1155_s11, 256  ;;  %p1518_p5 = scmp.lt.s32.totalorder %s1155_s11, %s1155_s11 }
 0x5b8   :  { %p1514_p4 = scmp.ne.s32.totalorder %s1155_s11, %s1513_s0  ;;  %p1519_p6 = scmp.lt.s32.totalorder %s1513_s0, %s1513_s0 }
 0x5ba   :  { %p1520_p7 = por %p1519_p6, %p1518_p5 }
 0x5bc   :  { %p1521_p8 = pnand %p1520_p7, %p1514_p4 }
 0x67f   :  { %v1132_v39 = vpop.f32.mrb[32].mxu1 }
 0x680   :  { %v1133_v40 = vadd.f32 %v1203_v16, %v1132_v39  ;;  %v1355_v41 = vpop.f32.mrb[33].mxu1 }
 0x681   :  { %v1135_v42 = vpop.f32.mrb[34].mxu1 }
 0x682   :  { %1139 = vst.msk [vmem:[#allocation8] sm:$0xff] %vm92_vm1, %v1133_v40  ;;  %v1136_v43 = vadd.f32 %v1203_v16, %v1135_v42  ;;  %v1356_v44 = vpop.f32.mrb[35].mxu1 }
 0x684   :  { %1140 = vst.msk [vmem:[#allocation8 + $0x8] sm:$0xff] %vm92_vm1, %v1136_v43 }
 0x685   :  { %1524 = shalt.err (!%p1521_p8)
}
 0x686   :  { %s1525_s12 = scalar_lea.hbm %s1883_s5, 256 }
 0x687   :  { %p1526_p9 = scmp.ne.s32.totalorder %s1883_s5, %s1525_s12  ;;  %p1529_p10 = scmp.lt.u32.totalorder %s1525_s12, %s1883_s5 }
 0x689   :  { %p1531_p11 = pnand %p1529_p10, %p1526_p9 }
 0x68b   :  { %1534 = shalt.err (!%p1531_p11)
}
 0x68c   :  { %1160 = dma.vmem_to_hbm [thread:$0]  %s1155_s11, 256, %s1883_s5, [#allocation4], %s1547_s1, %s1547_s1, %s1548_s21  }
 0x68d   :  { %1539 = dma.done.wait [#allocation4], 256  }
 0x68e   :  { %1540 = vsyncadd [#allocation4], 4294967040 }
 0x68f   :  { %1541 = dma.done.wait [#allocation10], 1024  }
 0x690   :  { %1542 = vsyncadd [#allocation10], 4294966272 }
 0x691   :  { %1179 = vsyncpa [#allocation3], 1 }
 0x692   :  { %1180 = vsyncpa [#allocation6], 1 }
 0x693   :  { %1181 = vsyncpa [#allocation4], 1 }
 0x694   :  { %1182 = vsyncpa [#allocation10], 1 }

</bundles_post_ra>
